<compile_context>
chip_gen: v6e
topology: v6e:2x2x1
jax: 0.10.0
libtpu: 0.0.40
codegen_flags: <defaults>
</compile_context>

<pallas_src>
import functools
import math

import jax
import jax.numpy as jnp
from jax.experimental import pallas as pl
from jax.experimental.pallas import tpu as pltpu

BN_EPS = 1e-5
_LANE = 128
_MAX_TILE_N = 2048  # (tile,256) f32 in+out double-buffered ~ 8 MiB; safe on v7x 64 MiB VMEM


def _pick_tile_n(n, max_tile=_MAX_TILE_N):
    """Row-tile size: multiple of 8, <= max_tile; when N fits in one tile we
    still split into ~2 tiles so the 'parallel' grid axis can shard across
    v7x's two TensorCores."""
    if n <= max_tile:
        half = -(-n // 2)                      # ceil(n / 2)
        t = ((half + 7) // 8) * 8              # round up to a sublane multiple
        return max(8, min(t, max_tile))
    return max_tile                            # 2048, already a multiple of 8


def _vq_kernel(x_ref, ws_ref, c_ref, wcode_ref, b2_ref,
               quant_ref, sse_ref, usage_ref, *, tile_n, valid_n):
    """One (TILE_N, D) tile of the VQ forward.

    x_ref:     (TN, D)   flattened inputs (native dtype)
    ws_ref:    (D, Kp)   folded score matrix  -2*bn_scale * W1 @ emb^T  (zero pad cols)
    c_ref:     (1, Kp)   ||emb||^2 - 2*b1@emb^T, +1e30 in the padding lanes
    wcode_ref: (Kp, D)   bn2_scale * emb @ W2, zero rows in the padding
    b2_ref:    (1, D)
    quant_ref: (TN, D)   decoded / straight-through output tile
    sse_ref:   (1, D)    per-tile column-sum of (q - x)^2 (partial MSE)
    usage_ref: (1, Kp)   per-tile one-hot counts
    """
    x = x_ref[...].astype(jnp.float32)                                    # (TN, D)

    # Single lane-dense score matmul; ||z||^2 dropped (argmin-invariant).
    x_mm = x_ref[...].astype(ws_ref.dtype)
    score = (jnp.dot(x_mm, ws_ref[...], preferred_element_type=jnp.float32)
             + c_ref[...])                                                # (TN, Kp)

    # first-minimum argmin (torch tie-breaking); padding lanes carry +1e30.
    k_pad = score.shape[1]
    col = jax.lax.broadcasted_iota(jnp.int32, score.shape, 1)
    smin = jnp.min(score, axis=1, keepdims=True)
    idx = jnp.min(jnp.where(score == smin, col, k_pad), axis=1, keepdims=True)
    enc = (col == idx).astype(jnp.float32)                                # (TN, Kp)

    # decode: one-hot @ (bn2_scale * emb @ W2) + b2 -- single lane-dense matmul
    q = jnp.dot(enc, wcode_ref[...], preferred_element_type=jnp.float32) + b2_ref[...]
    quant_ref[...] = q.astype(quant_ref.dtype)

    diff = q - x
    if valid_n % tile_n != 0:  # static: only emitted when the last tile is padded
        row = (jax.lax.broadcasted_iota(jnp.int32, (tile_n, 1), 0)
               + pl.program_id(0) * tile_n)
        valid = (row < valid_n).astype(jnp.float32)                       # (TN, 1)
        diff = diff * valid
        enc = enc * valid
    sse_ref[...] = jnp.sum(diff * diff, axis=0, keepdims=True)            # (1, D)
    usage_ref[...] = jnp.sum(enc, axis=0, keepdims=True)                  # (1, Kp)


def _codebook_forward(x, w_s_pad, c_pad, w_code_pad, b2,
                      *, input_dim, num_embeddings, commitment_cost):
    input_shape = x.shape
    flat = x.reshape(-1, input_dim)                                       # native dtype
    n, d = flat.shape
    k_pad = w_s_pad.shape[1]

    tile_n = _pick_tile_n(n)
    num_tiles = -(-n // tile_n)
    n_pad = num_tiles * tile_n
    flat_p = jnp.pad(flat, ((0, n_pad - n), (0, 0))) if n_pad != n else flat

    quant, sse_p, usage_p = pl.pallas_call(
        functools.partial(_vq_kernel, tile_n=tile_n, valid_n=n),
        grid=(num_tiles,),
        out_shape=(
            jax.ShapeDtypeStruct((n_pad, d), flat.dtype),                 # decoded / quantized
            jax.ShapeDtypeStruct((num_tiles, 1, d), jnp.float32),         # partial SSE
            jax.ShapeDtypeStruct((num_tiles, 1, k_pad), jnp.float32),     # partial usage
        ),
        in_specs=[
            pl.BlockSpec((tile_n, d), lambda i: (i, 0)),                  # x tile
            pl.BlockSpec((d, k_pad), lambda i: (0, 0)),                   # folded score matrix
            pl.BlockSpec((1, k_pad), lambda i: (0, 0)),                   # score bias
            pl.BlockSpec((k_pad, d), lambda i: (0, 0)),                   # folded decode matrix
            pl.BlockSpec((1, d), lambda i: (0, 0)),                       # b2
        ],
        out_specs=(
            pl.BlockSpec((tile_n, d), lambda i: (i, 0)),
            pl.BlockSpec((None, 1, d), lambda i: (i, 0, 0)),
            pl.BlockSpec((None, 1, k_pad), lambda i: (i, 0, 0)),
        ),
        compiler_params=pltpu.CompilerParams(
            dimension_semantics=("parallel",),
            vmem_limit_bytes=48 * 1024 * 1024,
        ),
    )(flat_p, w_s_pad, c_pad, w_code_pad, b2)

    x_recon = quant[:n].reshape(input_shape).astype(x.dtype)
    mse = jnp.sum(sse_p) / (n * d)
    loss = (1.0 + commitment_cost) * mse
    usage = jnp.sum(usage_p[:, 0, :num_embeddings], axis=0) / n
    return loss, x_recon, usage


class CodebookPallas:
    """JAX/Pallas port of Codebook(in_chan, num_embeddings, input_chan,
    embedding_dim, commitment_cost)."""

    def __init__(self, in_chan, num_embeddings, input_chan, embedding_dim,
                 commitment_cost, key, use_bf16_matmul=False):
        self.in_chan = in_chan
        self.num_embeddings = num_embeddings
        self.input_dim = input_chan ** 2
        self.embedding_dim = embedding_dim
        self.commitment_cost = float(commitment_cost)

        k_emb, k_w1, k_b1, k_w2, k_b2 = jax.random.split(key, 5)
        K, D, E = num_embeddings, self.input_dim, embedding_dim

        # nn.Embedding weight ~ U(-1/K, 1/K)
        self.embedding = jax.random.uniform(
            k_emb, (K, E), jnp.float32, minval=-1.0 / K, maxval=1.0 / K)
        # Linear params stored transposed so y = x @ W + b.
        lim1 = 1.0 / math.sqrt(D)
        self.w1 = jax.random.uniform(k_w1, (D, E), jnp.float32, -lim1, lim1)
        self.b1 = jax.random.uniform(k_b1, (1, E), jnp.float32, -lim1, lim1)
        lim2 = 1.0 / math.sqrt(E)
        self.w2 = jax.random.uniform(k_w2, (E, D), jnp.float32, -lim2, lim2)
        self.b2 = jax.random.uniform(k_b2, (1, D), jnp.float32, -lim2, lim2)

        # ---- one-time parameter folds (see module header) ----
        bn_scale = 1.0 / math.sqrt(1.0 + BN_EPS)   # eval BN: mean=0, var=1, w=1, b=0
        k_pad = ((K + _LANE - 1) // _LANE) * _LANE

        # score_k(x) = ||e_k||^2 - 2*b1.e_k - 2*bn_scale * x @ (W1 e_k)
        w_s = -2.0 * bn_scale * jnp.dot(self.w1, self.embedding.T)        # (D, K)
        c = (jnp.sum(self.embedding * self.embedding, axis=1)
             - 2.0 * jnp.dot(self.b1, self.embedding.T)[0])               # (K,)

        ws_dtype = jnp.bfloat16 if use_bf16_matmul else jnp.float32
        self.w_s_pad = jnp.zeros((D, k_pad), jnp.float32).at[:, :K].set(
            w_s).astype(ws_dtype)                                         # (D, Kp)
        self.c_pad = jnp.full((1, k_pad), 1e30, jnp.float32).at[0, :K].set(c)  # (1, Kp)
        self.w_code_pad = jnp.zeros((k_pad, D), jnp.float32).at[:K, :].set(
            bn_scale * jnp.dot(self.embedding, self.w2))                  # (Kp, D)

        self._forward = jax.jit(functools.partial(
            _codebook_forward,
            input_dim=self.input_dim,
            num_embeddings=K,
            commitment_cost=self.commitment_cost))

    def __call__(self, x):
        loss, x_recon, usage = self._forward(
            x, self.w_s_pad, self.c_pad, self.w_code_pad, self.b2)
        # Return device arrays; caller may .tolist() if it needs Python lists.
        return loss, x_recon, usage, self.embedding


def _reference_forward(model, x):
    """Dense pure-JAX reference of the original (eval-mode) PyTorch math."""
    bn_scale = 1.0 / math.sqrt(1.0 + BN_EPS)
    flat = x.reshape(-1, model.input_dim).astype(jnp.float32)
    z = jnp.dot(bn_scale * flat, model.w1) + model.b1
    dist = (jnp.sum(z * z, axis=1, keepdims=True)
            + jnp.sum(model.embedding * model.embedding, axis=1)[None, :]
            - 2.0 * jnp.dot(z, model.embedding.T))
    idx = jnp.argmin(dist, axis=1)
    q = jnp.dot(bn_scale * model.embedding[idx], model.w2) + model.b2
    mse = jnp.mean((q - flat) ** 2)
    loss = (1.0 + model.commitment_cost) * mse
    usage = jnp.mean(jax.nn.one_hot(idx, model.num_embeddings), axis=0)
    return loss, q.reshape(x.shape), usage


if __name__ == "__main__":
    key = jax.random.PRNGKey(0)
    k_param, k_x = jax.random.split(key)

    in_chan = 4
    input_chan = 16            # -> input_dim = 256
    num_embeddings = 64
    embedding_dim = 32
    commitment_cost = 0.25

    model = CodebookPallas(in_chan, num_embeddings, input_chan, embedding_dim,
                           commitment_cost, k_param)

    # x: (B, C, H, W) with H*W == input_chan**2
    x = jax.random.normal(k_x, (2, in_chan, input_chan, input_chan), jnp.float32)

    loss, x_recon, usage, codebook = model(x)
    jax.block_until_ready((loss, x_recon, usage))

    assert x_recon.shape == x.shape
    assert usage.shape == (num_embeddings,)
    assert codebook.shape == (num_embeddings, embedding_dim)
    assert bool(jnp.isfinite(loss))
    # each row selects exactly one code -> usage sums to 1
    assert abs(float(jnp.sum(usage)) - 1.0) < 1e-5

    # correctness vs a dense pure-JAX reference of the same eval-mode math
    ref_loss, ref_recon, ref_usage = _reference_forward(model, x)
    assert jnp.allclose(loss, ref_loss, rtol=1e-4, atol=1e-6)
    assert jnp.allclose(x_recon, ref_recon, rtol=1e-4, atol=1e-5)
    assert jnp.allclose(usage, ref_usage, atol=1e-6)

    print("KERNEL_OK")
</pallas_src>

<mosaic_0001>
module attributes {stable_mosaic.version = 11 : i64} {
  func.func @_vq_kernel(%arg0: i32, %arg1: memref<8x256xf32, #tpu.memory_space<vmem>>, %arg2: memref<256x128xf32, #tpu.memory_space<vmem>>, %arg3: memref<1x128xf32, #tpu.memory_space<vmem>>, %arg4: memref<128x256xf32, #tpu.memory_space<vmem>>, %arg5: memref<1x256xf32, #tpu.memory_space<vmem>>, %arg6: memref<8x256xf32, #tpu.memory_space<vmem>>, %arg7: memref<1x1x256xf32, #tpu.memory_space<vmem>>, %arg8: memref<1x1x128xf32, #tpu.memory_space<vmem>>) attributes {dimension_semantics = [#tpu.dimension_semantics<parallel>], iteration_bounds = array<i64: 1>, scalar_prefetch = 0 : i64, scratch_operands = 0 : i64, tpu.core_type = #tpu.core_type<tc>, window_params = [{transform_indices = @transform_0, window_bounds = array<i64: 8, 256>}, {pipeline_mode = #tpu.pipeline_mode<synchronous>, transform_indices = @transform_1, window_bounds = array<i64: 256, 128>}, {pipeline_mode = #tpu.pipeline_mode<synchronous>, transform_indices = @transform_2, window_bounds = array<i64: 1, 128>}, {pipeline_mode = #tpu.pipeline_mode<synchronous>, transform_indices = @transform_3, window_bounds = array<i64: 128, 256>}, {pipeline_mode = #tpu.pipeline_mode<synchronous>, transform_indices = @transform_4, window_bounds = array<i64: 1, 256>}, {transform_indices = @transform_5, window_bounds = array<i64: 8, 256>}, {transform_indices = @transform_6, window_bounds = array<i64: 1, 1, 256>}, {transform_indices = @transform_7, window_bounds = array<i64: 1, 1, 128>}]} {
    %c0 = arith.constant 0 : index
    %c0_0 = arith.constant 0 : index
    %0 = vector.load %arg1[%c0, %c0_0] : memref<8x256xf32, #tpu.memory_space<vmem>>, vector<8x256xf32>
    %c0_1 = arith.constant 0 : index
    %c0_2 = arith.constant 0 : index
    %1 = vector.load %arg1[%c0_1, %c0_2] : memref<8x256xf32, #tpu.memory_space<vmem>>, vector<8x256xf32>
    %c0_3 = arith.constant 0 : index
    %c0_4 = arith.constant 0 : index
    %2 = vector.load %arg2[%c0_3, %c0_4] : memref<256x128xf32, #tpu.memory_space<vmem>>, vector<256x128xf32>
    %cst = arith.constant dense<0.000000e+00> : vector<8x128xf32>
    %3 = tpu.matmul %1, %2, %cst {dimension_numbers = #tpu.dot_dimension_numbers<[1], [0], [0], [1], [0, 0, 1, 1], [], []>} : vector<8x256xf32>, vector<256x128xf32>, vector<8x128xf32> -> vector<8x128xf32>
    %c0_5 = arith.constant 0 : index
    %c0_6 = arith.constant 0 : index
    %4 = vector.load %arg3[%c0_5, %c0_6] : memref<1x128xf32, #tpu.memory_space<vmem>>, vector<1x128xf32>
    %5 = vector.broadcast %4 : vector<1x128xf32> to vector<8x128xf32>
    %6 = arith.addf %3, %5 : vector<8x128xf32>
    %7 = tpu.iota {dimensions = array<i32: 1>} : vector<8x128xi32>
    %cst_7 = arith.constant dense<0x7F800000> : vector<8xf32>
    %8 = vector.multi_reduction <minimumf>, %6, %cst_7 [1] : vector<8x128xf32> to vector<8xf32>
    %9 = vector.shape_cast %8 : vector<8xf32> to vector<8x1xf32>
    %10 = vector.broadcast %9 : vector<8x1xf32> to vector<8x128xf32>
    %11 = arith.cmpf oeq, %6, %10 : vector<8x128xf32>
    %c128_i32 = arith.constant 128 : i32
    %12 = vector.broadcast %c128_i32 : i32 to vector<8x128xi32>
    %13 = arith.select %11, %7, %12 : vector<8x128xi1>, vector<8x128xi32>
    %cst_8 = arith.constant dense<2147483647> : vector<8xi32>
    %14 = vector.multi_reduction <minsi>, %13, %cst_8 [1] : vector<8x128xi32> to vector<8xi32>
    %15 = vector.shape_cast %14 : vector<8xi32> to vector<8x1xi32>
    %16 = vector.broadcast %15 : vector<8x1xi32> to vector<8x128xi32>
    %17 = arith.cmpi eq, %7, %16 : vector<8x128xi32>
    %18 = arith.extui %17 : vector<8x128xi1> to vector<8x128xi32>
    %19 = arith.sitofp %18 : vector<8x128xi32> to vector<8x128xf32>
    %c0_9 = arith.constant 0 : index
    %c0_10 = arith.constant 0 : index
    %20 = vector.load %arg4[%c0_9, %c0_10] : memref<128x256xf32, #tpu.memory_space<vmem>>, vector<128x256xf32>
    %cst_11 = arith.constant dense<0.000000e+00> : vector<8x256xf32>
    %21 = tpu.matmul %19, %20, %cst_11 {dimension_numbers = #tpu.dot_dimension_numbers<[1], [0], [0], [1], [0, 0, 1, 1], [], []>} : vector<8x128xf32>, vector<128x256xf32>, vector<8x256xf32> -> vector<8x256xf32>
    %c0_12 = arith.constant 0 : index
    %c0_13 = arith.constant 0 : index
    %22 = vector.load %arg5[%c0_12, %c0_13] : memref<1x256xf32, #tpu.memory_space<vmem>>, vector<1x256xf32>
    %23 = vector.broadcast %22 : vector<1x256xf32> to vector<8x256xf32>
    %24 = arith.addf %21, %23 : vector<8x256xf32>
    %c0_14 = arith.constant 0 : index
    %c0_15 = arith.constant 0 : index
    %25 = vector.load %arg6[%c0_14, %c0_15] : memref<8x256xf32, #tpu.memory_space<vmem>>, vector<8x256xf32>
    tpu.vector_store %arg6[%c0_14, %c0_15], %24 {strides = array<i32>} : memref<8x256xf32, #tpu.memory_space<vmem>>, vector<8x256xf32>,
    %26 = arith.subf %24, %0 : vector<8x256xf32>
    %27 = arith.mulf %26, %26 : vector<8x256xf32>
    %cst_16 = arith.constant dense<0.000000e+00> : vector<256xf32>
    %28 = vector.multi_reduction <add>, %27, %cst_16 [0] : vector<8x256xf32> to vector<256xf32>
    %29 = vector.shape_cast %28 : vector<256xf32> to vector<1x256xf32>
    %c0_17 = arith.constant 0 : index
    %c0_18 = arith.constant 0 : index
    %c0_19 = arith.constant 0 : index
    %30 = vector.load %arg7[%c0_17, %c0_18, %c0_19] : memref<1x1x256xf32, #tpu.memory_space<vmem>>, vector<1x1x256xf32>
    %31 = vector.shape_cast %30 : vector<1x1x256xf32> to vector<1x256xf32>
    %32 = vector.shape_cast %29 : vector<1x256xf32> to vector<1x1x256xf32>
    tpu.vector_store %arg7[%c0_17, %c0_18, %c0_19], %32 {strides = array<i32>} : memref<1x1x256xf32, #tpu.memory_space<vmem>>, vector<1x1x256xf32>,
    %cst_20 = arith.constant dense<0.000000e+00> : vector<128xf32>
    %33 = vector.multi_reduction <add>, %19, %cst_20 [0] : vector<8x128xf32> to vector<128xf32>
    %34 = vector.shape_cast %33 : vector<128xf32> to vector<1x128xf32>
    %c0_21 = arith.constant 0 : index
    %c0_22 = arith.constant 0 : index
    %c0_23 = arith.constant 0 : index
    %35 = vector.load %arg8[%c0_21, %c0_22, %c0_23] : memref<1x1x128xf32, #tpu.memory_space<vmem>>, vector<1x1x128xf32>
    %36 = vector.shape_cast %35 : vector<1x1x128xf32> to vector<1x128xf32>
    %37 = vector.shape_cast %34 : vector<1x128xf32> to vector<1x1x128xf32>
    tpu.vector_store %arg8[%c0_21, %c0_22, %c0_23], %37 {strides = array<i32>} : memref<1x1x128xf32, #tpu.memory_space<vmem>>, vector<1x1x128xf32>,
    return
  }
  func.func @transform_0(%arg0: i32) -> (i32, i32) {
    %c0_i32 = arith.constant 0 : i32
    %c0_i32_0 = arith.constant 0 : i32
    return %arg0, %c0_i32 : i32, i32
  }
  func.func @transform_1(%arg0: i32) -> (i32, i32) {
    %c0_i32 = arith.constant 0 : i32
    %c0_i32_0 = arith.constant 0 : i32
    %c0_i32_1 = arith.constant 0 : i32
    return %c0_i32, %c0_i32_0 : i32, i32
  }
  func.func @transform_2(%arg0: i32) -> (i32, i32) {
    %c0_i32 = arith.constant 0 : i32
    %c0_i32_0 = arith.constant 0 : i32
    %c0_i32_1 = arith.constant 0 : i32
    return %c0_i32, %c0_i32_0 : i32, i32
  }
  func.func @transform_3(%arg0: i32) -> (i32, i32) {
    %c0_i32 = arith.constant 0 : i32
    %c0_i32_0 = arith.constant 0 : i32
    %c0_i32_1 = arith.constant 0 : i32
    return %c0_i32, %c0_i32_0 : i32, i32
  }
  func.func @transform_4(%arg0: i32) -> (i32, i32) {
    %c0_i32 = arith.constant 0 : i32
    %c0_i32_0 = arith.constant 0 : i32
    %c0_i32_1 = arith.constant 0 : i32
    return %c0_i32, %c0_i32_0 : i32, i32
  }
  func.func @transform_5(%arg0: i32) -> (i32, i32) {
    %c0_i32 = arith.constant 0 : i32
    %c0_i32_0 = arith.constant 0 : i32
    return %arg0, %c0_i32 : i32, i32
  }
  func.func @transform_6(%arg0: i32) -> (i32, i32, i32) {
    %c0_i32 = arith.constant 0 : i32
    %c0_i32_0 = arith.constant 0 : i32
    %c0_i32_1 = arith.constant 0 : i32
    return %arg0, %c0_i32, %c0_i32_0 : i32, i32, i32
  }
  func.func @transform_7(%arg0: i32) -> (i32, i32, i32) {
    %c0_i32 = arith.constant 0 : i32
    %c0_i32_0 = arith.constant 0 : i32
    %c0_i32_1 = arith.constant 0 : i32
    return %arg0, %c0_i32, %c0_i32_0 : i32, i32, i32
  }
}

</mosaic_0001>

<bundles_post_ra>
// kernel: _codebook_forward.1
= control target key start
LH: loop header
LB: loop body
LE: loop exit
PB: predicated region body
PF: predicated region fallthrough
CT: control target
= control target key end

     0   :  { %13 = vsyncpa [#allocation3], 0  ;;  %s547_s0 = inlined_call_operand.vmem [shape: f32[8,256], index: 0, kind: input, shape index: {}]   ;;  %s548_s1 = inlined_call_operand.hbm [shape: f32[256,128], index: 1, kind: input, shape index: {}]   ;;  %s549_s2 = inlined_call_operand.vmem [shape: f32[1,128], index: 2, kind: input, shape index: {}]   ;;  %s550_s3 = inlined_call_operand.hbm [shape: f32[128,256], index: 3, kind: input, shape index: {}]   ;;  %s551_s4 = inlined_call_operand.vmem [shape: f32[1,256], index: 4, kind: input, shape index: {}]   ;;  %s552_s5 = inlined_call_operand.vmem [shape: f32[8,256], index: 5, kind: output, shape index: {0}]   ;;  %s553_s6 = inlined_call_operand.vmem [shape: f32[1,1,256], index: 6, kind: output, shape index: {1}]   ;;  %s554_s7 = inlined_call_operand.vmem [shape: f32[1,1,128], index: 7, kind: output, shape index: {2}]  }
   0x1   :  { %14 = vsyncpa [#allocation5], 0  ;;  %s453_s24 = smov [#allocation2]  }
   0x2   :  { %s22_s25 = sshll.u32 %s453_s24, 4  ;;  %s23_s25 = int_to_ptr.vmem [resolvable:$true] %s22_s25 }
   0x3   :  { %s417_s26 = scalar_lea.vmem %s23_s25, 4096  ;;  %p422_p1 = scmp.lt.s32.totalorder %s23_s25, %s23_s25 }
   0x4   :  { %p418_p0 = scmp.ne.s32.totalorder %s23_s25, %s417_s26  ;;  %p423_p2 = scmp.lt.s32.totalorder %s417_s26, %s417_s26 }
   0x6   :  { %p424_p3 = por %p423_p2, %p422_p1 }
   0x8   :  { %p425_p4 = pnand %p424_p3, %p418_p0 }
   0xa   :  { %428 = shalt.err (!%p425_p4)
}
   0xb   :  { %s454_s27 = smov 128   ;;  %s455_s28 = smov 8  }
   0xc   :  { %28 = dma.hbm_to_vmem [thread:$0]  %s548_s1, 4096, %s23_s25, [#allocation3], %s454_s27, %s454_s27, %s455_s28  }
   0xd   :  { %s456_s8 = smov [#allocation4]  }
   0xe   :  { %s36_s9 = sshll.u32 %s456_s8, 4  ;;  %s37_s9 = int_to_ptr.vmem [resolvable:$true] %s36_s9 }
   0xf   :  { %s437_s10 = scalar_lea.vmem %s37_s9, 4096  ;;  %p442_p6 = scmp.lt.s32.totalorder %s37_s9, %s37_s9 }
  0x10   :  { %p438_p5 = scmp.ne.s32.totalorder %s37_s9, %s437_s10  ;;  %p443_p7 = scmp.lt.s32.totalorder %s437_s10, %s437_s10 }
  0x12   :  { %p444_p8 = por %p443_p7, %p442_p6 }
  0x14   :  { %p445_p9 = pnand %p444_p8, %p438_p5 }
  0x16   :  { %448 = shalt.err (!%p445_p9)
}
  0x17   :  { %s457_s11 = smov 256   ;;  %s458_s12 = smov 16  }
  0x18   :  { %42 = dma.hbm_to_vmem [thread:$0]  %s550_s3, 4096, %s37_s9, [#allocation5], %s457_s11, %s457_s11, %s458_s12  }
  0x19   :  { %449 = dma.done.wait [#allocation3], 4096  }
  0x1a   :  { %450 = vsyncadd [#allocation3], 4294963200 }
  0x1b   :  { %451 = dma.done.wait [#allocation5], 4096  }
  0x1c   :  { %452 = vsyncadd [#allocation5], 4294963200  ;;  %v84_v0 = vld [vmem:[#allocation2 + $0xf8] sm:$0xff]  ;;  %v83_v2 = vld [vmem:[#allocation2 + $0xf0] sm:$0xff]  ;;  %v162_v39 = vlaneseq }
  0x1d   :  { %v68_v1 = vld [vmem:[#allocation2 + $0x78] sm:$0xff]  ;;  %365 = vmatprep.subr.mxu0 %v84_v0  ;;  %v67_v3 = vld [vmem:[#allocation2 + $0x70] sm:$0xff]  ;;  %v82_v4 = vld [vmem:[#allocation2 + $0xe8] sm:$0xff] }
  0x1e   :  { %366 = vmatpush3.msra.mxu0 %v68_v1  ;;  %v66_v5 = vld [vmem:[#allocation2 + $0x68] sm:$0xff]  ;;  %v81_v6 = vld [vmem:[#allocation2 + $0xe0] sm:$0xff]  ;;  %v80_v8 = vld [vmem:[#allocation2 + $0xd8] sm:$0xff]  ;;  %v524_v40 = vand.u32 127, %v162_v39  ;;  %vm338_vm3 = vcmp.lt.s32.totalorder %v162_v39, 256 }
  0x1f   :  { %367 = vmatprep.subr.mxu0 %v83_v2  ;;  %v65_v7 = vld [vmem:[#allocation2 + $0x60] sm:$0xff]  ;;  %v64_v9 = vld [vmem:[#allocation2 + $0x58] sm:$0xff]  ;;  %v79_v10 = vld [vmem:[#allocation2 + $0xd0] sm:$0xff] }
  0x20   :  { %368 = vmatpush3.msra.mxu0 %v67_v3  ;;  %v63_v11 = vld [vmem:[#allocation2 + $0x50] sm:$0xff]  ;;  %v78_v12 = vld [vmem:[#allocation2 + $0xc8] sm:$0xff]  ;;  %v77_v15 = vld [vmem:[#allocation2 + $0xc0] sm:$0xff] }
  0x21   :  { %369 = vmatprep.subr.mxu0 %v82_v4  ;;  %v511_v13 = vld [vmem:[%s547_s0 + $0x8] sm:$0xff]  ;;  %v61_v16 = vld [vmem:[#allocation2 + $0x40] sm:$0xff]  ;;  %v76_v17 = vld [vmem:[#allocation2 + $0xb8] sm:$0xff] }
  0x22   :  { %370 = vmatpush3.msra.mxu0 %v66_v5  ;;  %v62_v14 = vld [vmem:[#allocation2 + $0x48] sm:$0xff]  ;;  %156 = vmatprep.mubr.f32.mxu0 %v511_v13  ;;  %v60_v18 = vld [vmem:[#allocation2 + $0x38] sm:$0xff]  ;;  %v75_v19 = vld [vmem:[#allocation2 + $0xb0] sm:$0xff] }
  0x23   :  { %371 = vmatprep.subr.mxu0 %v81_v6  ;;  %v59_v20 = vld [vmem:[#allocation2 + $0x30] sm:$0xff]  ;;  %v74_v21 = vld [vmem:[#allocation2 + $0xa8] sm:$0xff]  ;;  %v73_v23 = vld [vmem:[#allocation2 + $0xa0] sm:$0xff] }
  0x24   :  { %372 = vmatpush3.msra.mxu0 %v65_v7  ;;  %v58_v22 = vld [vmem:[#allocation2 + $0x28] sm:$0xff]  ;;  %v57_v24 = vld [vmem:[#allocation2 + $0x20] sm:$0xff]  ;;  %v72_v25 = vld [vmem:[#allocation2 + $0x98] sm:$0xff] }
  0x25   :  { %373 = vmatprep.subr.mxu0 %v80_v8  ;;  %v56_v26 = vld [vmem:[#allocation2 + $0x18] sm:$0xff]  ;;  %v71_v27 = vld [vmem:[#allocation2 + $0x90] sm:$0xff]  ;;  %v70_v29 = vld [vmem:[#allocation2 + $0x88] sm:$0xff] }
  0x26   :  { %374 = vmatpush3.msra.mxu0 %v64_v9  ;;  %v55_v28 = vld [vmem:[#allocation2 + $0x10] sm:$0xff]  ;;  %v54_v30 = vld [vmem:[#allocation2 + $0x8] sm:$0xff]  ;;  %v69_v31 = vld [vmem:[#allocation2 + $0x80] sm:$0xff] }
  0x27   :  { %375 = vmatprep.subr.mxu0 %v79_v10  ;;  %v53_v32 = vld [vmem:[#allocation2] sm:$0xff]  ;;  %v216_v45 = vld [vmem:[#allocation4 + $0xf8] sm:$0xff]  ;;  %v215_v46 = vld [vmem:[#allocation4 + $0xf0] sm:$0xff] }
  0x28   :  { %376 = vmatpush3.msra.mxu0 %v63_v11  ;;  %v517_v33 = vld [vmem:[%s547_s0] sm:$0xff]  ;;  %v214_v47 = vld [vmem:[#allocation4 + $0xe8] sm:$0xff]  ;;  %229 = vmatprep.subr.mxu1 %v216_v45  ;;  %v212_v49 = vld [vmem:[#allocation4 + $0xd8] sm:$0xff] }
  0x29   :  { %377 = vmatprep.subr.mxu0 %v78_v12  ;;  %v362_v36 = vld [vmem:[%s549_s2] ss:$0 sm:$0xff]  ;;  %230 = vmatpush1.msra.mxu1 %v215_v46  ;;  %v211_v50 = vld [vmem:[#allocation4 + $0xd0] sm:$0xff]  ;;  %v210_v51 = vld [vmem:[#allocation4 + $0xc8] sm:$0xff] }
  0x2a   :  { %378 = vmatpush3.msra.mxu0 %v62_v14  ;;  %v213_v48 = vld [vmem:[#allocation4 + $0xe0] sm:$0xff]  ;;  %231 = vmatprep.subr.mxu1 %v214_v47  ;;  %v208_v53 = vld [vmem:[#allocation4 + $0xb8] sm:$0xff]  ;;  %v207_v54 = vld [vmem:[#allocation4 + $0xb0] sm:$0xff] }
  0x2b   :  { %379 = vmatprep.subr.mxu0 %v77_v15  ;;  %232 = vmatpush1.msra.mxu1 %v213_v48  ;;  %v209_v52 = vld [vmem:[#allocation4 + $0xc0] sm:$0xff]  ;;  %v206_v55 = vld [vmem:[#allocation4 + $0xa8] sm:$0xff]  ;;  %v204_v57 = vld [vmem:[#allocation4 + $0x98] sm:$0xff] }
  0x2c   :  { %380 = vmatpush3.msra.mxu0 %v61_v16  ;;  %233 = vmatprep.subr.mxu1 %v212_v49  ;;  %v205_v56 = vld [vmem:[#allocation4 + $0xa0] sm:$0xff]  ;;  %v203_v58 = vld [vmem:[#allocation4 + $0x90] sm:$0xff]  ;;  %v202_v59 = vld [vmem:[#allocation4 + $0x88] sm:$0xff] }
  0x2d   :  { %381 = vmatprep.subr.mxu0 %v76_v17  ;;  %234 = vmatpush1.msra.mxu1 %v211_v50  ;;  %v201_v60 = vld [vmem:[#allocation4 + $0x80] sm:$0xff]  ;;  %v200_v61 = vld [vmem:[#allocation4 + $0x78] sm:$0xff]  ;;  %v199_v62 = vld [vmem:[#allocation4 + $0x70] sm:$0xff] }
  0x2e   :  { %382 = vmatpush3.msra.mxu0 %v60_v18  ;;  %235 = vmatprep.subr.mxu1 %v210_v51  ;;  %v198_v63 = vld [vmem:[#allocation4 + $0x68] sm:$0xff]  ;;  %v197_v0 = vld [vmem:[#allocation4 + $0x60] sm:$0xff]  ;;  %v196_v1 = vld [vmem:[#allocation4 + $0x58] sm:$0xff]  ;;  %v459_v18 = vmov 0.0  }
  0x2f   :  { %383 = vmatprep.subr.mxu0 %v75_v19  ;;  %236 = vmatpush1.msra.mxu1 %v209_v52  ;;  %v195_v2 = vld [vmem:[#allocation4 + $0x50] sm:$0xff]  ;;  %v194_v3 = vld [vmem:[#allocation4 + $0x48] sm:$0xff]  ;;  %v193_v4 = vld [vmem:[#allocation4 + $0x40] sm:$0xff]  ;;  %v461_v52 = vmov 1966171168  }
  0x30   :  { %384 = vmatpush3.msra.mxu0 %v59_v20  ;;  %237 = vmatprep.subr.mxu1 %v208_v53  ;;  %v192_v5 = vld [vmem:[#allocation4 + $0x38] sm:$0xff]  ;;  %v191_v6 = vld [vmem:[#allocation4 + $0x30] sm:$0xff]  ;;  %v190_v7 = vld [vmem:[#allocation4 + $0x28] sm:$0xff]  ;;  %v322_v53 = vunpack.c.l.s4 %v461_v52 }
  0x31   :  { %385 = vmatprep.subr.mxu0 %v74_v21  ;;  %238 = vmatpush1.msra.mxu1 %v207_v54  ;;  %v189_v12 = vld [vmem:[#allocation4 + $0x20] sm:$0xff]  ;;  %v188_v14 = vld [vmem:[#allocation4 + $0x18] sm:$0xff]  ;;  %v187_v15 = vld [vmem:[#allocation4 + $0x10] sm:$0xff] }
  0x32   :  { %386 = vmatpush3.msra.mxu0 %v58_v22  ;;  %239 = vmatprep.subr.mxu1 %v206_v55  ;;  %v186_v16 = vld [vmem:[#allocation4 + $0x8] sm:$0xff]  ;;  %v185_v17 = vld [vmem:[#allocation4] sm:$0xff] }
  0x33   :  { %387 = vmatprep.subr.mxu0 %v73_v23  ;;  %240 = vmatpush1.msra.mxu1 %v205_v56 }
  0x34   :  { %388 = vmatpush3.msra.mxu0 %v57_v24  ;;  %241 = vmatprep.subr.mxu1 %v204_v57 }
  0x35   :  { %389 = vmatprep.subr.mxu0 %v72_v25  ;;  %242 = vmatpush1.msra.mxu1 %v203_v58  ;;  %v460_v25 = vmov 1.0  }
  0x36   :  { %390 = vmatpush3.msra.mxu0 %v56_v26  ;;  %243 = vmatprep.subr.mxu1 %v202_v59 }
  0x37   :  { %391 = vmatprep.subr.mxu0 %v71_v27  ;;  %244 = vmatpush1.msra.mxu1 %v201_v60 }
  0x38   :  { %392 = vmatpush3.msra.mxu0 %v55_v28  ;;  %245 = vmatprep.subr.mxu1 %v200_v61 }
  0x39   :  { %393 = vmatprep.subr.mxu0 %v70_v29  ;;  %246 = vmatpush1.msra.mxu1 %v199_v62 }
  0x3a   :  { %394 = vmatpush3.msra.mxu0 %v54_v30  ;;  %247 = vmatprep.subr.mxu1 %v198_v63 }
  0x3b   :  { %395 = vmatprep.subr.mxu0 %v69_v31  ;;  %248 = vmatpush1.msra.mxu1 %v197_v0 }
  0x3c   :  { %396 = vmatpush3.msra.mxu0 %v53_v32  ;;  %249 = vmatprep.subr.mxu1 %v196_v1  ;;  %v220_v32 = vshrl.u32 %v162_v39, 7 }
  0x3d   :  { %157 = vmatmul.mubr.f32.vlgmr.msra.gmra.mxu0 %v517_v33  ;;  %250 = vmatpush1.msra.mxu1 %v195_v2 }
  0x3e   :  { %251 = vmatprep.subr.mxu1 %v194_v3  ;;  %293 = vmatprep.mubr.f32.mxu1 %v459_v18 }
  0x3f   :  { %252 = vmatpush1.msra.mxu1 %v193_v4 }
  0x40   :  { %253 = vmatprep.subr.mxu1 %v192_v5 }
  0x41   :  { %254 = vmatpush1.msra.mxu1 %v191_v6 }
  0x42   :  { %255 = vmatprep.subr.mxu1 %v190_v7 }
  0x43   :  { %256 = vmatpush1.msra.mxu1 %v189_v12 }
  0x44   :  { %257 = vmatprep.subr.mxu1 %v188_v14 }
  0x45   :  { %258 = vmatpush1.msra.mxu1 %v187_v15 }
  0x46   :  { %259 = vmatprep.subr.mxu1 %v186_v16 }
  0x47   :  { %260 = vmatpush1.msra.mxu1 %v185_v17 }
  0xfd   :  { %v397_v34 = vpop.f32.mrf.mxu0 }
  0xff   :  { %v398_v35 = vpop.f32.mrf.mxu0 }
 0x100   :  { %v399_v37 = vadd.f32 %v398_v35, %v397_v34  ;;  %v221_v34 = vsub.s32 0, %v220_v32  ;;  %v217_v35 = vld [vmem:[%s551_s4] sm:$0x3] }
 0x102   :  { %v159_v38 = vadd.f32 %v399_v37, %v362_v36  ;;  %v225_v36 = vsub.s32 1, %v220_v32  ;;  %v222_v37 = vrot.slane %v217_v35, %v221_v34 }
 0x104   :  { %164 = vmin.xlane.f32.xlu0 %v159_v38 }
 0x18d   :  { %v165_v41 = vpop.xlane.xlu0 %164 }
 0x18e   :  { %vm166_vm0 = vcmp.eq.f32.partialorder %v159_v38, %v165_v41  ;;  %v226_v38 = vrot.slane %v217_v35, %v225_v36 }
 0x18f   :  { %v167_v42 = vsel %vm166_vm0, %v524_v40, 128 }
 0x190   :  { %v169_v43 = vshra.s32 %v167_v42, 16  ;;  %v168_v8 = vand.u32 65535, %v167_v42 }
 0x192   :  { %v171_v44 = vcvt.s32.f32 %v169_v43  ;;  %v170_v10 = vcvt.s32.f32 %v168_v8 }
 0x194   :  { %172 = vmin.xlane.f32.xlu0 %v171_v44 }
 0x21d   :  { %v173_v9 = vpop.xlane.xlu0 %172 }
 0x21e   :  { %vm174_vm1 = vcmp.eq.f32.partialorder %v171_v44, %v173_v9  ;;  %v179_v19 = vcvt.f32.s32 %v173_v9 }
 0x21f   :  { %v175_v11 = vsel %vm174_vm1, %v170_v10, inf }
 0x220   :  { %176 = vmin.xlane.f32.xlu1 %v175_v11  ;;  %v180_v21 = vshll.u32 %v179_v19, 16 }
 0x2a9   :  { %v177_v20 = vpop.xlane.xlu1 %176 }
 0x2aa   :  { %v178_v22 = vcvt.f32.s32 %v177_v20 }
 0x2ac   :  { %v181_v23 = vadd.s32 %v180_v21, %v178_v22 }
 0x2ae   :  { %vm182_vm2 = vcmp.eq.s32.totalorder %v524_v40, %v181_v23 }
 0x2af   :  { %v363_v24 = vsel %vm182_vm2, 1.0, %v459_v18  ;;  %364 = vmatmul.mubr.msk.f32.vlgmr.msra.gmra.mxu1 %vm182_vm2, %v460_v25 }
 0x2b0   :  { %v341_v26 = vrot.slane %v363_v24, 4 }
 0x2b2   :  { %v342_v27 = vadd.f32 %v363_v24, %v341_v26 }
 0x2b4   :  { %v343_v28 = vrot.slane %v342_v27, 2 }
 0x2b6   :  { %v344_v29 = vadd.f32 %v343_v28, %v342_v27 }
 0x2b8   :  { %v345_v30 = vrot.slane %v344_v29, 1 }
 0x2ba   :  { %v346_v31 = vadd.f32 %v345_v30, %v344_v29 }
 0x2bc   :  { %347 = vst [vmem:[%s554_s7] sm:$0x1] %v346_v31 }
 0x36f   :  { %v295_v40 = vpop.f32.mrf.mxu1 }
 0x370   :  { %v296_v41 = vadd.f32 %v295_v40, %v222_v37 }
 0x371   :  { %v297_v42 = vpop.f32.mrf.mxu1 }
 0x372   :  { %300 = vst [vmem:[%s552_s5] sm:$0xff] %v296_v41  ;;  %v302_v43 = vsub.f32 %v296_v41, %v517_v33  ;;  %v298_v44 = vadd.f32 %v297_v42, %v226_v38  ;;  %v323_v33 = vunpack.c.0.s8 %v322_v53 }
 0x374   :  { %v304_v45 = vmul.f32 %v302_v43, %v302_v43  ;;  %301 = vst [vmem:[%s552_s5 + $0x8] sm:$0xff] %v298_v44  ;;  %v303_v46 = vsub.f32 %v298_v44, %v511_v13  ;;  %v326_v61 = vsub.s32 %v323_v33, %v220_v32 }
 0x376   :  { %v306_v47 = vrot.slane %v304_v45, 4  ;;  %v305_v48 = vmul.f32 %v303_v46, %v303_v46 }
 0x378   :  { %v307_v49 = vadd.f32 %v306_v47, %v304_v45  ;;  %v312_v50 = vrot.slane %v305_v48, 4 }
 0x37a   :  { %v308_v51 = vrot.slane %v307_v49, 2  ;;  %v313_v54 = vadd.f32 %v312_v50, %v305_v48 }
 0x37c   :  { %v309_v55 = vadd.f32 %v308_v51, %v307_v49  ;;  %v314_v56 = vrot.slane %v313_v54, 2 }
 0x37e   :  { %v310_v57 = vrot.slane %v309_v55, 1  ;;  %v315_v58 = vadd.f32 %v314_v56, %v313_v54 }
 0x380   :  { %v316_v59 = vrot.slane %v315_v58, 1  ;;  %v311_v60 = vadd.f32 %v310_v57, %v309_v55 }
 0x382   :  { %v317_v62 = vadd.f32 %v316_v59, %v315_v58 }
 0x384   :  { %v320_v63 = vcombine.low %v311_v60, %v317_v62 }
 0x386   :  { %v327_v0 = vrot.slane %v320_v63, %v326_v61 }
 0x388   :  { %v334_v13 = vrot.slane %v327_v0, %v326_v61 }
 0x38a   :  { %340 = vst.msk [vmem:[%s553_s6] sm:$0x3] %vm338_vm3, %v334_v13 }
 0x38b   :  { %360 = vsyncpa [#allocation3], 1 }
 0x38c   :  { %361 = vsyncpa [#allocation5], 1 }

</bundles_post_ra>
